<compile_context>
chip_gen: v7x
topology: tpu7x:2x2x1
jax: 0.10.0
libtpu: 0.0.40
codegen_flags: <defaults>
</compile_context>

<pallas_src>
import functools
import math

import jax
import jax.numpy as jnp
from jax.experimental import pallas as pl
from jax.experimental.pallas import tpu as pltpu


# ---------------------------------------------------------------------------
# Kernel
# ---------------------------------------------------------------------------
def _lora_mha_kernel(
    q_ref, k_ref, v_ref,            # (1, tq, H), (1, Skv, H), (1, Skv, H)  compute dtype
    wa_ref, ba_ref,                 # (3, H, r) cdt      , (3, 1, r)      f32
    wd_ref, bd_ref,                 # (3, nh, r, hd) cdt , (3, nh, 1, hd) f32 (Q slab pre-scaled)
    wo_ref, bo_ref,                 # (nh, hd, H) cdt    , (1, H)         f32
    out_ref,                        # (1, tq, H)
    k_sc, v_sc,                     # VMEM scratch (nh, Skv, hd), compute dtype
    *, num_heads: int, compute_dtype, approx_recip: bool,
):
    f32 = jnp.float32
    nh = num_heads

    def lora_heads(x, idx):
        # x: (rows, H) -> LoRA A -> (rows, r) -> per-head LoRA D -> (nh, rows, hd)
        rows = x.shape[0]
        h = jnp.dot(x, wa_ref[idx], preferred_element_type=f32)       # (rows, r) f32 acc
        h = (h + ba_ref[idx]).astype(compute_dtype)                   # bias in f32
        # TODO(synk): replace broadcast + K=r batched matmul with one
        # (rows, r) @ (r, H) matmul + a single head-split relayout once that
        # reshape/transpose lowers reliably for small head_dim.
        hb = jnp.broadcast_to(h[None], (nh, rows, h.shape[-1]))       # (nh, rows, r)
        y = jax.lax.dot_general(
            hb, wd_ref[idx],
            dimension_numbers=(((2,), (1,)), ((0,), (0,))),
            preferred_element_type=f32)                               # (nh, rows, hd)
        return (y + bd_ref[idx]).astype(compute_dtype)

    # Project K/V only once per batch entry; reuse across all query tiles.
    @pl.when(pl.program_id(1) == 0)
    def _():
        k_sc[...] = lora_heads(k_ref[0], 1)
        v_sc[...] = lora_heads(v_ref[0], 2)

    q = lora_heads(q_ref[0], 0)          # (nh, tq, hd); 1/sqrt(hd) folded in wrapper
    k = k_sc[...]                         # (nh, Skv, hd)
    v = v_sc[...]                         # (nh, Skv, hd)

    # scores[n, i, j] = <q[n, i, :], k[n, j, :]>  (batched over heads, f32 acc)
    scores = jax.lax.dot_general(
        q, k, dimension_numbers=(((2,), (2,)), ((0,), (0,))),
        preferred_element_type=f32)                                   # (nh, tq, Skv)

    # softmax (f32 VPU/EUP path, valid on all generations)
    scores = scores - jnp.max(scores, axis=-1, keepdims=True)
    p = jnp.exp(scores)
    denom = jnp.sum(p, axis=-1, keepdims=True)                        # (nh, tq, 1) f32

    # Unnormalized P @ V, then normalize the small (nh, tq, hd) result
    # (Skv/hd fewer VPU multiplies than normalizing the score tile).
    attn = jax.lax.dot_general(
        p.astype(compute_dtype), v,
        dimension_numbers=(((2,), (1,)), ((0,), (0,))),
        preferred_element_type=f32)                                   # (nh, tq, hd)
    attn = (attn * pl.reciprocal(denom, approx=approx_recip)).astype(compute_dtype)

    # Output projection: accumulate per-head (tq, hd) @ (hd, H) directly into a
    # single (tq, H) f32 accumulator (no (nh, tq, H) intermediate, no head sum).
    acc = jnp.dot(attn[0], wo_ref[0], preferred_element_type=f32)
    for n in range(1, nh):
        acc = acc + jnp.dot(attn[n], wo_ref[n], preferred_element_type=f32)
    out_ref[0] = (acc + bo_ref[...]).astype(out_ref.dtype)


# ---------------------------------------------------------------------------
# Wrapper
# ---------------------------------------------------------------------------
def _vmem_budget_bytes():
    try:
        cap = int(pltpu.get_tpu_info().vmem_capacity_bytes)
    except Exception:
        cap = 64 * 1024 * 1024            # conservative (v7x-sized) fallback
    return max(32 * 1024 * 1024, int(0.8 * cap))


def lora_multi_head_attention(query, key, value, params, *, num_heads,
                              compute_dtype=jnp.bfloat16):
    """params are in PyTorch layout: W is (out_dim, in_dim), biases are 1-D."""
    B, Sq, H = query.shape
    Skv = key.shape[1]
    assert value.shape == key.shape
    assert H % num_heads == 0
    head_dim = H // num_heads

    (wqa, bqa, wqd, bqd,
     wka, bka, wkd, bkd,
     wva, bva, wvd, bvd,
     wo, bo) = params
    rank = wqa.shape[0]

    cdt = jnp.dtype(compute_dtype)
    f32 = jnp.float32
    out_dtype = query.dtype
    inv_scale = 1.0 / math.sqrt(head_dim)

    # ---- one-time weight prep (outside the kernel): transpose to (in, out),
    # ---- split LoRA-D and W_o per head, fold the softmax scale into the Q
    # ---- decoder, cast MXU operands to compute dtype; biases stay f32.
    def prep_a(w):                                   # (r, H) -> (H, r)
        return jnp.asarray(w, f32).T.astype(cdt)

    def prep_d(w, scale=1.0):                        # (H, r) -> (nh, r, hd)
        wt = jnp.asarray(w, f32).T * scale           # (r, H)
        return wt.reshape(rank, num_heads, head_dim).transpose(1, 0, 2).astype(cdt)

    def prep_bd(b, scale=1.0):                       # (H,) -> (nh, 1, hd)
        return (jnp.asarray(b, f32) * scale).reshape(num_heads, 1, head_dim)

    wa = jnp.stack([prep_a(wqa), prep_a(wka), prep_a(wva)])                 # (3, H, r)
    ba = jnp.stack([jnp.asarray(b, f32).reshape(1, rank)
                    for b in (bqa, bka, bva)])                              # (3, 1, r)
    wd = jnp.stack([prep_d(wqd, inv_scale), prep_d(wkd), prep_d(wvd)])      # (3, nh, r, hd)
    bd = jnp.stack([prep_bd(bqd, inv_scale), prep_bd(bkd), prep_bd(bvd)])   # (3, nh, 1, hd)
    wo_h = jnp.asarray(wo, f32).T.reshape(num_heads, head_dim, H).astype(cdt)
    bo2 = jnp.asarray(bo, f32).reshape(1, H)
    weights = [wa, ba, wd, bd, wo_h, bo2]

    # ---- cast activations to the MXU compute dtype in the wrapper (halves
    # ---- Q/K/V DMA bytes; all accumulation inside the kernel stays f32).
    query = query.astype(cdt)
    key = key.astype(cdt)
    value = value.astype(cdt)

    # ---- query-tile size from an explicit per-step VMEM footprint estimate.
    def nbytes(a):
        return a.size * a.dtype.itemsize

    weight_bytes = sum(nbytes(w) for w in weights)
    cdt_b = cdt.itemsize
    out_b = jnp.dtype(out_dtype).itemsize
    budget = _vmem_budget_bytes()

    def footprint(tq):
        io = (2 * tq * H * cdt_b              # query tile (double-buffered)
              + 2 * 2 * Skv * H * cdt_b       # key + value (double-buffered)
              + 2 * tq * H * out_b)           # output tile (double-buffered)
        scratch = 2 * num_heads * Skv * head_dim * cdt_b
        inter = (num_heads * tq * Skv * (8 + cdt_b)                       # scores + p + p cast
                 + num_heads * (tq + Skv) * head_dim * (4 + cdt_b)        # q heads / kv proj / attn
                 + num_heads * max(tq, Skv) * rank * (4 + cdt_b)          # LoRA hidden (broadcast)
                 + 2 * tq * H * 4)                                        # W_o accumulator
        return 2 * weight_bytes + io + scratch + int(1.3 * inter)

    cands = sorted({c for c in (8, 16, 32, 64, 128, 256, 512, 1024)
                    if Sq % c == 0} | {Sq}, reverse=True)
    tq = next((c for c in cands if footprint(c) <= budget), cands[-1])
    nq = Sq // tq

    def full_spec(arr):
        zeros = (0,) * arr.ndim
        return pl.BlockSpec(arr.shape, lambda b, qi, _z=zeros: _z)
    # TODO(synk): single-buffer the invariant weight / K / V blocks
    # (pipeline_mode=pl.Buffered(1)) once that is robust across jax versions.

    in_specs = [
        pl.BlockSpec((1, tq, H), lambda b, qi: (b, qi, 0)),    # query tile
        pl.BlockSpec((1, Skv, H), lambda b, qi: (b, 0, 0)),    # full key (per batch)
        pl.BlockSpec((1, Skv, H), lambda b, qi: (b, 0, 0)),    # full value (per batch)
    ] + [full_spec(w) for w in weights]
    out_spec = pl.BlockSpec((1, tq, H), lambda b, qi: (b, qi, 0))

    kernel = functools.partial(
        _lora_mha_kernel,
        num_heads=num_heads,
        compute_dtype=cdt,
        approx_recip=(cdt != jnp.dtype(jnp.float32)),
    )

    return pl.pallas_call(
        kernel,
        out_shape=jax.ShapeDtypeStruct((B, Sq, H), out_dtype),
        grid_spec=pltpu.PrefetchScalarGridSpec(
            num_scalar_prefetch=0,
            grid=(B, nq),
            in_specs=in_specs,
            out_specs=out_spec,
            scratch_shapes=[
                pltpu.VMEM((num_heads, Skv, head_dim), cdt),   # cached projected K
                pltpu.VMEM((num_heads, Skv, head_dim), cdt),   # cached projected V
            ],
        ),
        compiler_params=pltpu.CompilerParams(
            # Batch axis: independent work for megacore. Query-tile axis must be
            # sequential ("arbitrary") so the cached K/V scratch is valid.
            dimension_semantics=("parallel", "arbitrary"),
            vmem_limit_bytes=budget,
        ),
    )(query, key, value, *weights)


# ---------------------------------------------------------------------------
# Deterministic parameter init (xavier-uniform weights, zero biases),
# PyTorch layout: W is (out_dim, in_dim), biases are 1-D vectors.
# ---------------------------------------------------------------------------
def _xavier_uniform(key, out_dim, in_dim, dtype=jnp.float32):
    limit = (6.0 / (in_dim + out_dim)) ** 0.5
    return jax.random.uniform(key, (out_dim, in_dim), dtype,
                              minval=-limit, maxval=limit)


def make_params(key, hidden_dim, rank=16):
    keys = jax.random.split(key, 7)
    wqa = _xavier_uniform(keys[0], rank, hidden_dim)
    bqa = jnp.zeros((rank,), jnp.float32)
    wqd = _xavier_uniform(keys[1], hidden_dim, rank)
    bqd = jnp.zeros((hidden_dim,), jnp.float32)
    wka = _xavier_uniform(keys[2], rank, hidden_dim)
    bka = jnp.zeros((rank,), jnp.float32)
    wkd = _xavier_uniform(keys[3], hidden_dim, rank)
    bkd = jnp.zeros((hidden_dim,), jnp.float32)
    wva = _xavier_uniform(keys[4], rank, hidden_dim)
    bva = jnp.zeros((rank,), jnp.float32)
    wvd = _xavier_uniform(keys[5], hidden_dim, rank)
    bvd = jnp.zeros((hidden_dim,), jnp.float32)
    wo = _xavier_uniform(keys[6], hidden_dim, hidden_dim)
    bo = jnp.zeros((hidden_dim,), jnp.float32)
    return (wqa, bqa, wqd, bqd, wka, bka, wkd, bkd,
            wva, bva, wvd, bvd, wo, bo)


# ---------------------------------------------------------------------------
# Pure-JAX reference for correctness check
# ---------------------------------------------------------------------------
def reference(query, key, value, params, *, num_heads):
    (wqa, bqa, wqd, bqd, wka, bka, wkd, bkd,
     wva, bva, wvd, bvd, wo, bo) = params
    B, S, H = query.shape
    hd = H // num_heads

    def lin(x, w, b):
        return x @ w.T + b

    def lora(x, wa, ba, wd, bd):
        return lin(lin(x, wa, ba), wd, bd)

    q = lora(query, wqa, bqa, wqd, bqd)
    k = lora(key, wka, bka, wkd, bkd)
    v = lora(value, wva, bva, wvd, bvd)

    q = q.reshape(B, S, num_heads, hd).transpose(0, 2, 1, 3)
    k = k.reshape(B, S, num_heads, hd).transpose(0, 2, 1, 3)
    v = v.reshape(B, S, num_heads, hd).transpose(0, 2, 1, 3)

    scores = jnp.einsum("bhqd,bhkd->bhqk", q, k) / (hd ** 0.5)
    attn = jax.nn.softmax(scores, axis=-1)
    out = jnp.einsum("bhqk,bhkd->bhqd", attn, v)
    out = out.transpose(0, 2, 1, 3).reshape(B, S, H)
    return lin(out, wo, bo)


# ---------------------------------------------------------------------------
if __name__ == "__main__":
    B, S, H = 2, 8, 32
    NUM_HEADS = 4

    root = jax.random.PRNGKey(0)
    kq, kk, kv, kp = jax.random.split(root, 4)

    query = jax.random.normal(kq, (B, S, H), jnp.float32)
    key_ = jax.random.normal(kk, (B, S, H), jnp.float32)
    value = jax.random.normal(kv, (B, S, H), jnp.float32)

    params = make_params(kp, H, rank=16)
    ref = reference(query, key_, value, params, num_heads=NUM_HEADS)

    # Exact-precision path (f32 MXU operands, exact reciprocal).
    out_f32 = lora_multi_head_attention(query, key_, value, params,
                                        num_heads=NUM_HEADS,
                                        compute_dtype=jnp.float32)
    out_f32 = jax.block_until_ready(out_f32)
    assert out_f32.shape == (B, S, H)
    err32 = jnp.max(jnp.abs(out_f32 - ref))
    assert jnp.allclose(out_f32, ref, atol=1e-3, rtol=1e-3), \
        f"f32 path max abs err {err32}"

    # Fast path (bf16 MXU operands, f32 accumulation, approx reciprocal).
    out_bf16 = lora_multi_head_attention(query, key_, value, params,
                                         num_heads=NUM_HEADS,
                                         compute_dtype=jnp.bfloat16)
    out_bf16 = jax.block_until_ready(out_bf16)
    err16 = jnp.max(jnp.abs(out_bf16.astype(jnp.float32) - ref))
    assert jnp.allclose(out_bf16.astype(jnp.float32), ref,
                        atol=1e-1, rtol=1e-1), \
        f"bf16 path max abs err {err16}"

    print("KERNEL_OK")
</pallas_src>

<mosaic_0001>
module attributes {stable_mosaic.version = 11 : i64} {
  func.func @_lora_mha_kernel(%arg0: i32, %arg1: i32, %arg2: memref<1x8x32xf32, #tpu.memory_space<vmem>>, %arg3: memref<1x8x32xf32, #tpu.memory_space<vmem>>, %arg4: memref<1x8x32xf32, #tpu.memory_space<vmem>>, %arg5: memref<3x32x16xf32, #tpu.memory_space<vmem>>, %arg6: memref<3x1x16xf32, #tpu.memory_space<vmem>>, %arg7: memref<3x4x16x8xf32, #tpu.memory_space<vmem>>, %arg8: memref<3x4x1x8xf32, #tpu.memory_space<vmem>>, %arg9: memref<4x8x32xf32, #tpu.memory_space<vmem>>, %arg10: memref<1x32xf32, #tpu.memory_space<vmem>>, %arg11: memref<1x8x32xf32, #tpu.memory_space<vmem>>, %arg12: memref<4x8x8xf32, #tpu.memory_space<vmem>>, %arg13: memref<4x8x8xf32, #tpu.memory_space<vmem>>) attributes {dimension_semantics = [#tpu.dimension_semantics<parallel>, #tpu.dimension_semantics<arbitrary>], iteration_bounds = array<i64: 2, 1>, scalar_prefetch = 0 : i64, scratch_operands = 2 : i64, tpu.core_type = #tpu.core_type<tc>, window_params = [{transform_indices = @transform_0, window_bounds = array<i64: 1, 8, 32>}, {transform_indices = @transform_1, window_bounds = array<i64: 1, 8, 32>}, {transform_indices = @transform_2, window_bounds = array<i64: 1, 8, 32>}, {pipeline_mode = #tpu.pipeline_mode<synchronous>, transform_indices = @transform_3, window_bounds = array<i64: 3, 32, 16>}, {pipeline_mode = #tpu.pipeline_mode<synchronous>, transform_indices = @transform_4, window_bounds = array<i64: 3, 1, 16>}, {pipeline_mode = #tpu.pipeline_mode<synchronous>, transform_indices = @transform_5, window_bounds = array<i64: 3, 4, 16, 8>}, {pipeline_mode = #tpu.pipeline_mode<synchronous>, transform_indices = @transform_6, window_bounds = array<i64: 3, 4, 1, 8>}, {pipeline_mode = #tpu.pipeline_mode<synchronous>, transform_indices = @transform_7, window_bounds = array<i64: 4, 8, 32>}, {pipeline_mode = #tpu.pipeline_mode<synchronous>, transform_indices = @transform_8, window_bounds = array<i64: 1, 32>}, {transform_indices = @transform_9, window_bounds = array<i64: 1, 8, 32>}]} {
    %c0_i32 = arith.constant 0 : i32
    %0 = arith.cmpi eq, %arg1, %c0_i32 : i32
    %1 = arith.extui %0 : i1 to i32
    %c0_i32_0 = arith.constant 0 : i32
    %2 = arith.cmpi ne, %1, %c0_i32_0 : i32
    scf.if %2 {
      %c0_46 = arith.constant 0 : index
      %c0_47 = arith.constant 0 : index
      %c0_48 = arith.constant 0 : index
      %65 = vector.load %arg3[%c0_46, %c0_47, %c0_48] : memref<1x8x32xf32, #tpu.memory_space<vmem>>, vector<1x8x32xf32>
      %66 = vector.shape_cast %65 : vector<1x8x32xf32> to vector<8x32xf32>
      %c1_49 = arith.constant 1 : index
      %c0_50 = arith.constant 0 : index
      %c0_51 = arith.constant 0 : index
      %67 = vector.load %arg5[%c1_49, %c0_50, %c0_51] : memref<3x32x16xf32, #tpu.memory_space<vmem>>, vector<1x32x16xf32>
      %68 = vector.shape_cast %67 : vector<1x32x16xf32> to vector<32x16xf32>
      %cst_52 = arith.constant dense<0.000000e+00> : vector<8x16xf32>
      %69 = tpu.matmul %66, %68, %cst_52 {dimension_numbers = #tpu.dot_dimension_numbers<[1], [0], [0], [1], [0, 0, 1, 1], [], []>} : vector<8x32xf32>, vector<32x16xf32>, vector<8x16xf32> -> vector<8x16xf32>
      %c1_53 = arith.constant 1 : index
      %c0_54 = arith.constant 0 : index
      %c0_55 = arith.constant 0 : index
      %70 = vector.load %arg6[%c1_53, %c0_54, %c0_55] : memref<3x1x16xf32, #tpu.memory_space<vmem>>, vector<1x1x16xf32>
      %71 = vector.shape_cast %70 : vector<1x1x16xf32> to vector<1x16xf32>
      %72 = vector.broadcast %71 : vector<1x16xf32> to vector<8x16xf32>
      %73 = arith.addf %69, %72 : vector<8x16xf32>
      %74 = vector.shape_cast %73 : vector<8x16xf32> to vector<1x8x16xf32>
      %75 = vector.shape_cast %74 : vector<1x8x16xf32> to vector<1x8x16xf32>
      %76 = vector.broadcast %75 : vector<1x8x16xf32> to vector<4x8x16xf32>
      %c1_56 = arith.constant 1 : index
      %c0_57 = arith.constant 0 : index
      %c0_58 = arith.constant 0 : index
      %c0_59 = arith.constant 0 : index
      %77 = vector.load %arg7[%c1_56, %c0_57, %c0_58, %c0_59] : memref<3x4x16x8xf32, #tpu.memory_space<vmem>>, vector<1x4x16x8xf32>
      %78 = vector.shape_cast %77 : vector<1x4x16x8xf32> to vector<4x16x8xf32>
      %cst_60 = arith.constant dense<0.000000e+00> : vector<4x8x8xf32>
      %79 = tpu.matmul %76, %78, %cst_60 {dimension_numbers = #tpu.dot_dimension_numbers<[2], [1], [1], [2], [0, 0, 0, 1, 1, 2], [0], [0]>} : vector<4x8x16xf32>, vector<4x16x8xf32>, vector<4x8x8xf32> -> vector<4x8x8xf32>
      %c1_61 = arith.constant 1 : index
      %c0_62 = arith.constant 0 : index
      %c0_63 = arith.constant 0 : index
      %c0_64 = arith.constant 0 : index
      %80 = vector.load %arg8[%c1_61, %c0_62, %c0_63, %c0_64] : memref<3x4x1x8xf32, #tpu.memory_space<vmem>>, vector<1x4x1x8xf32>
      %81 = vector.shape_cast %80 : vector<1x4x1x8xf32> to vector<4x1x8xf32>
      %82 = vector.broadcast %81 : vector<4x1x8xf32> to vector<4x8x8xf32>
      %83 = arith.addf %79, %82 : vector<4x8x8xf32>
      %c0_65 = arith.constant 0 : index
      %c0_66 = arith.constant 0 : index
      %c0_67 = arith.constant 0 : index
      %84 = vector.load %arg12[%c0_65, %c0_66, %c0_67] : memref<4x8x8xf32, #tpu.memory_space<vmem>>, vector<4x8x8xf32>
      tpu.vector_store %arg12[%c0_65, %c0_66, %c0_67], %83 {strides = array<i32>} : memref<4x8x8xf32, #tpu.memory_space<vmem>>, vector<4x8x8xf32>,
      %c0_68 = arith.constant 0 : index
      %c0_69 = arith.constant 0 : index
      %c0_70 = arith.constant 0 : index
      %85 = vector.load %arg4[%c0_68, %c0_69, %c0_70] : memref<1x8x32xf32, #tpu.memory_space<vmem>>, vector<1x8x32xf32>
      %86 = vector.shape_cast %85 : vector<1x8x32xf32> to vector<8x32xf32>
      %c2_71 = arith.constant 2 : index
      %c0_72 = arith.constant 0 : index
      %c0_73 = arith.constant 0 : index
      %87 = vector.load %arg5[%c2_71, %c0_72, %c0_73] : memref<3x32x16xf32, #tpu.memory_space<vmem>>, vector<1x32x16xf32>
      %88 = vector.shape_cast %87 : vector<1x32x16xf32> to vector<32x16xf32>
      %cst_74 = arith.constant dense<0.000000e+00> : vector<8x16xf32>
      %89 = tpu.matmul %86, %88, %cst_74 {dimension_numbers = #tpu.dot_dimension_numbers<[1], [0], [0], [1], [0, 0, 1, 1], [], []>} : vector<8x32xf32>, vector<32x16xf32>, vector<8x16xf32> -> vector<8x16xf32>
      %c2_75 = arith.constant 2 : index
      %c0_76 = arith.constant 0 : index
      %c0_77 = arith.constant 0 : index
      %90 = vector.load %arg6[%c2_75, %c0_76, %c0_77] : memref<3x1x16xf32, #tpu.memory_space<vmem>>, vector<1x1x16xf32>
      %91 = vector.shape_cast %90 : vector<1x1x16xf32> to vector<1x16xf32>
      %92 = vector.broadcast %91 : vector<1x16xf32> to vector<8x16xf32>
      %93 = arith.addf %89, %92 : vector<8x16xf32>
      %94 = vector.shape_cast %93 : vector<8x16xf32> to vector<1x8x16xf32>
      %95 = vector.shape_cast %94 : vector<1x8x16xf32> to vector<1x8x16xf32>
      %96 = vector.broadcast %95 : vector<1x8x16xf32> to vector<4x8x16xf32>
      %c2_78 = arith.constant 2 : index
      %c0_79 = arith.constant 0 : index
      %c0_80 = arith.constant 0 : index
      %c0_81 = arith.constant 0 : index
      %97 = vector.load %arg7[%c2_78, %c0_79, %c0_80, %c0_81] : memref<3x4x16x8xf32, #tpu.memory_space<vmem>>, vector<1x4x16x8xf32>
      %98 = vector.shape_cast %97 : vector<1x4x16x8xf32> to vector<4x16x8xf32>
      %cst_82 = arith.constant dense<0.000000e+00> : vector<4x8x8xf32>
      %99 = tpu.matmul %96, %98, %cst_82 {dimension_numbers = #tpu.dot_dimension_numbers<[2], [1], [1], [2], [0, 0, 0, 1, 1, 2], [0], [0]>} : vector<4x8x16xf32>, vector<4x16x8xf32>, vector<4x8x8xf32> -> vector<4x8x8xf32>
      %c2_83 = arith.constant 2 : index
      %c0_84 = arith.constant 0 : index
      %c0_85 = arith.constant 0 : index
      %c0_86 = arith.constant 0 : index
      %100 = vector.load %arg8[%c2_83, %c0_84, %c0_85, %c0_86] : memref<3x4x1x8xf32, #tpu.memory_space<vmem>>, vector<1x4x1x8xf32>
      %101 = vector.shape_cast %100 : vector<1x4x1x8xf32> to vector<4x1x8xf32>
      %102 = vector.broadcast %101 : vector<4x1x8xf32> to vector<4x8x8xf32>
      %103 = arith.addf %99, %102 : vector<4x8x8xf32>
      %c0_87 = arith.constant 0 : index
      %c0_88 = arith.constant 0 : index
      %c0_89 = arith.constant 0 : index
      %104 = vector.load %arg13[%c0_87, %c0_88, %c0_89] : memref<4x8x8xf32, #tpu.memory_space<vmem>>, vector<4x8x8xf32>
      tpu.vector_store %arg13[%c0_87, %c0_88, %c0_89], %103 {strides = array<i32>} : memref<4x8x8xf32, #tpu.memory_space<vmem>>, vector<4x8x8xf32>,
    } else {
    }
    %c0 = arith.constant 0 : index
    %c0_1 = arith.constant 0 : index
    %c0_2 = arith.constant 0 : index
    %3 = vector.load %arg2[%c0, %c0_1, %c0_2] : memref<1x8x32xf32, #tpu.memory_space<vmem>>, vector<1x8x32xf32>
    %4 = vector.shape_cast %3 : vector<1x8x32xf32> to vector<8x32xf32>
    %c0_3 = arith.constant 0 : index
    %c0_4 = arith.constant 0 : index
    %c0_5 = arith.constant 0 : index
    %5 = vector.load %arg5[%c0_3, %c0_4, %c0_5] : memref<3x32x16xf32, #tpu.memory_space<vmem>>, vector<1x32x16xf32>
    %6 = vector.shape_cast %5 : vector<1x32x16xf32> to vector<32x16xf32>
    %cst = arith.constant dense<0.000000e+00> : vector<8x16xf32>
    %7 = tpu.matmul %4, %6, %cst {dimension_numbers = #tpu.dot_dimension_numbers<[1], [0], [0], [1], [0, 0, 1, 1], [], []>} : vector<8x32xf32>, vector<32x16xf32>, vector<8x16xf32> -> vector<8x16xf32>
    %c0_6 = arith.constant 0 : index
    %c0_7 = arith.constant 0 : index
    %c0_8 = arith.constant 0 : index
    %8 = vector.load %arg6[%c0_6, %c0_7, %c0_8] : memref<3x1x16xf32, #tpu.memory_space<vmem>>, vector<1x1x16xf32>
    %9 = vector.shape_cast %8 : vector<1x1x16xf32> to vector<1x16xf32>
    %10 = vector.broadcast %9 : vector<1x16xf32> to vector<8x16xf32>
    %11 = arith.addf %7, %10 : vector<8x16xf32>
    %12 = vector.shape_cast %11 : vector<8x16xf32> to vector<1x8x16xf32>
    %13 = vector.shape_cast %12 : vector<1x8x16xf32> to vector<1x8x16xf32>
    %14 = vector.broadcast %13 : vector<1x8x16xf32> to vector<4x8x16xf32>
    %c0_9 = arith.constant 0 : index
    %c0_10 = arith.constant 0 : index
    %c0_11 = arith.constant 0 : index
    %c0_12 = arith.constant 0 : index
    %15 = vector.load %arg7[%c0_9, %c0_10, %c0_11, %c0_12] : memref<3x4x16x8xf32, #tpu.memory_space<vmem>>, vector<1x4x16x8xf32>
    %16 = vector.shape_cast %15 : vector<1x4x16x8xf32> to vector<4x16x8xf32>
    %cst_13 = arith.constant dense<0.000000e+00> : vector<4x8x8xf32>
    %17 = tpu.matmul %14, %16, %cst_13 {dimension_numbers = #tpu.dot_dimension_numbers<[2], [1], [1], [2], [0, 0, 0, 1, 1, 2], [0], [0]>} : vector<4x8x16xf32>, vector<4x16x8xf32>, vector<4x8x8xf32> -> vector<4x8x8xf32>
    %c0_14 = arith.constant 0 : index
    %c0_15 = arith.constant 0 : index
    %c0_16 = arith.constant 0 : index
    %c0_17 = arith.constant 0 : index
    %18 = vector.load %arg8[%c0_14, %c0_15, %c0_16, %c0_17] : memref<3x4x1x8xf32, #tpu.memory_space<vmem>>, vector<1x4x1x8xf32>
    %19 = vector.shape_cast %18 : vector<1x4x1x8xf32> to vector<4x1x8xf32>
    %20 = vector.broadcast %19 : vector<4x1x8xf32> to vector<4x8x8xf32>
    %21 = arith.addf %17, %20 : vector<4x8x8xf32>
    %c0_18 = arith.constant 0 : index
    %c0_19 = arith.constant 0 : index
    %c0_20 = arith.constant 0 : index
    %22 = vector.load %arg12[%c0_18, %c0_19, %c0_20] : memref<4x8x8xf32, #tpu.memory_space<vmem>>, vector<4x8x8xf32>
    %c0_21 = arith.constant 0 : index
    %c0_22 = arith.constant 0 : index
    %c0_23 = arith.constant 0 : index
    %23 = vector.load %arg13[%c0_21, %c0_22, %c0_23] : memref<4x8x8xf32, #tpu.memory_space<vmem>>, vector<4x8x8xf32>
    %cst_24 = arith.constant dense<0.000000e+00> : vector<4x8x8xf32>
    %24 = tpu.matmul %21, %22, %cst_24 {dimension_numbers = #tpu.dot_dimension_numbers<[2], [2], [1], [1], [0, 0, 0, 1, 1, 1], [0], [0]>} : vector<4x8x8xf32>, vector<4x8x8xf32>, vector<4x8x8xf32> -> vector<4x8x8xf32>
    %cst_25 = arith.constant dense<0xFF800000> : vector<4x8xf32>
    %25 = vector.multi_reduction <maximumf>, %24, %cst_25 [2] : vector<4x8x8xf32> to vector<4x8xf32>
    %26 = vector.shape_cast %25 : vector<4x8xf32> to vector<4x8x1xf32>
    %27 = vector.broadcast %26 : vector<4x8x1xf32> to vector<4x8x8xf32>
    %28 = arith.subf %24, %27 : vector<4x8x8xf32>
    %29 = math.exp %28 : vector<4x8x8xf32>
    %cst_26 = arith.constant dense<0.000000e+00> : vector<4x8xf32>
    %30 = vector.multi_reduction <add>, %29, %cst_26 [2] : vector<4x8x8xf32> to vector<4x8xf32>
    %31 = vector.shape_cast %30 : vector<4x8xf32> to vector<4x8x1xf32>
    %cst_27 = arith.constant dense<0.000000e+00> : vector<4x8x8xf32>
    %32 = tpu.matmul %29, %23, %cst_27 {dimension_numbers = #tpu.dot_dimension_numbers<[2], [1], [1], [2], [0, 0, 0, 1, 1, 2], [0], [0]>} : vector<4x8x8xf32>, vector<4x8x8xf32>, vector<4x8x8xf32> -> vector<4x8x8xf32>
    %33 = tpu.reciprocal %31 : vector<4x8x1xf32> -> vector<4x8x1xf32>
    %34 = vector.broadcast %33 : vector<4x8x1xf32> to vector<4x8x8xf32>
    %35 = arith.mulf %32, %34 : vector<4x8x8xf32>
    %36 = vector.extract_strided_slice %35 {offsets = [0, 0, 0], sizes = [1, 8, 8], strides = [1, 1, 1]} : vector<4x8x8xf32> to vector<1x8x8xf32>
    %37 = vector.shape_cast %36 : vector<1x8x8xf32> to vector<8x8xf32>
    %c0_28 = arith.constant 0 : index
    %c0_29 = arith.constant 0 : index
    %c0_30 = arith.constant 0 : index
    %38 = vector.load %arg9[%c0_28, %c0_29, %c0_30] : memref<4x8x32xf32, #tpu.memory_space<vmem>>, vector<1x8x32xf32>
    %39 = vector.shape_cast %38 : vector<1x8x32xf32> to vector<8x32xf32>
    %cst_31 = arith.constant dense<0.000000e+00> : vector<8x32xf32>
    %40 = tpu.matmul %37, %39, %cst_31 {dimension_numbers = #tpu.dot_dimension_numbers<[1], [0], [0], [1], [0, 0, 1, 1], [], []>} : vector<8x8xf32>, vector<8x32xf32>, vector<8x32xf32> -> vector<8x32xf32>
    %41 = vector.extract_strided_slice %35 {offsets = [1, 0, 0], sizes = [1, 8, 8], strides = [1, 1, 1]} : vector<4x8x8xf32> to vector<1x8x8xf32>
    %42 = vector.shape_cast %41 : vector<1x8x8xf32> to vector<8x8xf32>
    %c1 = arith.constant 1 : index
    %c0_32 = arith.constant 0 : index
    %c0_33 = arith.constant 0 : index
    %43 = vector.load %arg9[%c1, %c0_32, %c0_33] : memref<4x8x32xf32, #tpu.memory_space<vmem>>, vector<1x8x32xf32>
    %44 = vector.shape_cast %43 : vector<1x8x32xf32> to vector<8x32xf32>
    %cst_34 = arith.constant dense<0.000000e+00> : vector<8x32xf32>
    %45 = tpu.matmul %42, %44, %cst_34 {dimension_numbers = #tpu.dot_dimension_numbers<[1], [0], [0], [1], [0, 0, 1, 1], [], []>} : vector<8x8xf32>, vector<8x32xf32>, vector<8x32xf32> -> vector<8x32xf32>
    %46 = arith.addf %40, %45 : vector<8x32xf32>
    %47 = vector.extract_strided_slice %35 {offsets = [2, 0, 0], sizes = [1, 8, 8], strides = [1, 1, 1]} : vector<4x8x8xf32> to vector<1x8x8xf32>
    %48 = vector.shape_cast %47 : vector<1x8x8xf32> to vector<8x8xf32>
    %c2 = arith.constant 2 : index
    %c0_35 = arith.constant 0 : index
    %c0_36 = arith.constant 0 : index
    %49 = vector.load %arg9[%c2, %c0_35, %c0_36] : memref<4x8x32xf32, #tpu.memory_space<vmem>>, vector<1x8x32xf32>
    %50 = vector.shape_cast %49 : vector<1x8x32xf32> to vector<8x32xf32>
    %cst_37 = arith.constant dense<0.000000e+00> : vector<8x32xf32>
    %51 = tpu.matmul %48, %50, %cst_37 {dimension_numbers = #tpu.dot_dimension_numbers<[1], [0], [0], [1], [0, 0, 1, 1], [], []>} : vector<8x8xf32>, vector<8x32xf32>, vector<8x32xf32> -> vector<8x32xf32>
    %52 = arith.addf %46, %51 : vector<8x32xf32>
    %53 = vector.extract_strided_slice %35 {offsets = [3, 0, 0], sizes = [1, 8, 8], strides = [1, 1, 1]} : vector<4x8x8xf32> to vector<1x8x8xf32>
    %54 = vector.shape_cast %53 : vector<1x8x8xf32> to vector<8x8xf32>
    %c3 = arith.constant 3 : index
    %c0_38 = arith.constant 0 : index
    %c0_39 = arith.constant 0 : index
    %55 = vector.load %arg9[%c3, %c0_38, %c0_39] : memref<4x8x32xf32, #tpu.memory_space<vmem>>, vector<1x8x32xf32>
    %56 = vector.shape_cast %55 : vector<1x8x32xf32> to vector<8x32xf32>
    %cst_40 = arith.constant dense<0.000000e+00> : vector<8x32xf32>
    %57 = tpu.matmul %54, %56, %cst_40 {dimension_numbers = #tpu.dot_dimension_numbers<[1], [0], [0], [1], [0, 0, 1, 1], [], []>} : vector<8x8xf32>, vector<8x32xf32>, vector<8x32xf32> -> vector<8x32xf32>
    %58 = arith.addf %52, %57 : vector<8x32xf32>
    %c0_41 = arith.constant 0 : index
    %c0_42 = arith.constant 0 : index
    %59 = vector.load %arg10[%c0_41, %c0_42] : memref<1x32xf32, #tpu.memory_space<vmem>>, vector<1x32xf32>
    %60 = vector.broadcast %59 : vector<1x32xf32> to vector<8x32xf32>
    %61 = arith.addf %58, %60 : vector<8x32xf32>
    %c0_43 = arith.constant 0 : index
    %c0_44 = arith.constant 0 : index
    %c0_45 = arith.constant 0 : index
    %62 = vector.load %arg11[%c0_43, %c0_44, %c0_45] : memref<1x8x32xf32, #tpu.memory_space<vmem>>, vector<1x8x32xf32>
    %63 = vector.shape_cast %62 : vector<1x8x32xf32> to vector<8x32xf32>
    %64 = vector.shape_cast %61 : vector<8x32xf32> to vector<1x8x32xf32>
    tpu.vector_store %arg11[%c0_43, %c0_44, %c0_45], %64 {strides = array<i32>} : memref<1x8x32xf32, #tpu.memory_space<vmem>>, vector<1x8x32xf32>,
    return
  }
  func.func @transform_0(%arg0: i32, %arg1: i32) -> (i32, i32, i32) {
    %c0_i32 = arith.constant 0 : i32
    %c0_i32_0 = arith.constant 0 : i32
    return %arg0, %arg1, %c0_i32 : i32, i32, i32
  }
  func.func @transform_1(%arg0: i32, %arg1: i32) -> (i32, i32, i32) {
    %c0_i32 = arith.constant 0 : i32
    %c0_i32_0 = arith.constant 0 : i32
    %c0_i32_1 = arith.constant 0 : i32
    return %arg0, %c0_i32, %c0_i32_0 : i32, i32, i32
  }
  func.func @transform_2(%arg0: i32, %arg1: i32) -> (i32, i32, i32) {
    %c0_i32 = arith.constant 0 : i32
    %c0_i32_0 = arith.constant 0 : i32
    %c0_i32_1 = arith.constant 0 : i32
    return %arg0, %c0_i32, %c0_i32_0 : i32, i32, i32
  }
  func.func @transform_3(%arg0: i32, %arg1: i32) -> (i32, i32, i32) {
    %c0_i32 = arith.constant 0 : i32
    %c0_i32_0 = arith.constant 0 : i32
    %c0_i32_1 = arith.constant 0 : i32
    %c0_i32_2 = arith.constant 0 : i32
    return %c0_i32, %c0_i32_0, %c0_i32_1 : i32, i32, i32
  }
  func.func @transform_4(%arg0: i32, %arg1: i32) -> (i32, i32, i32) {
    %c0_i32 = arith.constant 0 : i32
    %c0_i32_0 = arith.constant 0 : i32
    %c0_i32_1 = arith.constant 0 : i32
    %c0_i32_2 = arith.constant 0 : i32
    return %c0_i32, %c0_i32_0, %c0_i32_1 : i32, i32, i32
  }
  func.func @transform_5(%arg0: i32, %arg1: i32) -> (i32, i32, i32, i32) {
    %c0_i32 = arith.constant 0 : i32
    %c0_i32_0 = arith.constant 0 : i32
    %c0_i32_1 = arith.constant 0 : i32
    %c0_i32_2 = arith.constant 0 : i32
    %c0_i32_3 = arith.constant 0 : i32
    return %c0_i32, %c0_i32_0, %c0_i32_1, %c0_i32_2 : i32, i32, i32, i32
  }
  func.func @transform_6(%arg0: i32, %arg1: i32) -> (i32, i32, i32, i32) {
    %c0_i32 = arith.constant 0 : i32
    %c0_i32_0 = arith.constant 0 : i32
    %c0_i32_1 = arith.constant 0 : i32
    %c0_i32_2 = arith.constant 0 : i32
    %c0_i32_3 = arith.constant 0 : i32
    return %c0_i32, %c0_i32_0, %c0_i32_1, %c0_i32_2 : i32, i32, i32, i32
  }
  func.func @transform_7(%arg0: i32, %arg1: i32) -> (i32, i32, i32) {
    %c0_i32 = arith.constant 0 : i32
    %c0_i32_0 = arith.constant 0 : i32
    %c0_i32_1 = arith.constant 0 : i32
    %c0_i32_2 = arith.constant 0 : i32
    return %c0_i32, %c0_i32_0, %c0_i32_1 : i32, i32, i32
  }
  func.func @transform_8(%arg0: i32, %arg1: i32) -> (i32, i32) {
    %c0_i32 = arith.constant 0 : i32
    %c0_i32_0 = arith.constant 0 : i32
    %c0_i32_1 = arith.constant 0 : i32
    return %c0_i32, %c0_i32_0 : i32, i32
  }
  func.func @transform_9(%arg0: i32, %arg1: i32) -> (i32, i32, i32) {
    %c0_i32 = arith.constant 0 : i32
    %c0_i32_0 = arith.constant 0 : i32
    return %arg0, %arg1, %c0_i32 : i32, i32, i32
  }
}

</mosaic_0001>

<bundles_post_ra>
// kernel: tpu_custom_call.1
= control target key start
LH: loop header
LB: loop body
LE: loop exit
PB: predicated region body
PF: predicated region fallthrough
CT: control target
= control target key end

     0   :  { %14 = vsyncpa [#allocation5], 0  ;;  %s3727_s0 = inlined_call_operand.vmem [shape: f32[2,8,32], index: 0, kind: input, shape index: {}]   ;;  %s3728_s1 = inlined_call_operand.vmem [shape: f32[2,8,32], index: 1, kind: input, shape index: {}]   ;;  %s3729_s2 = inlined_call_operand.vmem [shape: f32[2,8,32], index: 2, kind: input, shape index: {}]   ;;  %s3730_s3 = inlined_call_operand.vmem [shape: f32[3,32,16], index: 3, kind: input, shape index: {}]   ;;  %s3731_s4 = inlined_call_operand.vmem [shape: f32[3,1,16], index: 4, kind: input, shape index: {}]   ;;  %s3732_s5 = inlined_call_operand.vmem [shape: f32[3,4,16,8], index: 5, kind: input, shape index: {}]   ;;  %s3733_s6 = inlined_call_operand.vmem [shape: f32[3,4,1,8], index: 6, kind: input, shape index: {}]   ;;  %s3734_s7 = inlined_call_operand.vmem [shape: f32[4,8,32], index: 7, kind: input, shape index: {}]   ;;  %s3735_s8 = inlined_call_operand.vmem [shape: f32[1,32], index: 8, kind: input, shape index: {}]   ;;  %s3736_s9 = inlined_call_operand.hbm [shape: f32[2,8,32], index: 9, kind: output, shape index: {}]  }
   0x1   :  { %16 = vsyncpa [#allocation5 + $0x1], 0  ;;  %s3304_s30 = smov 0   ;;  %s3306_s10 = smov 0  }
   0x2   :  { %s3308_s11 = smov 0   ;;  %s3310_s12 = smov 0  }
   0x3   :  { %s3312_s13 = smov 0   ;;  %s3314_s14 = smov 0  }
   0x4 LB: > { %s2693_s15 = sadd.s32 4294967295, %s3248_s14   ;;  %s2694_s16 = sadd.s32 4294967294, %s3248_s14   ;;  %s3248_s14 = sphi %s3314_s14, %s22_s14   ;;  %s3244_s13 = sphi %s3312_s13, %s3743_s13   ;;  %s3240_s12 = sphi %s3310_s12, %s3742_s12   ;;  %s3236_s11 = sphi %s3308_s11, %s3741_s11   ;;  %s3232_s10 = sphi %s3306_s10, %s3740_s10   ;;  %s3228_s30 = sphi %s3304_s30, %s3739_s30  }
   0x5   : > { %s34_s17 = sadd.s32 1, %s3244_s13  ;;  %s249_s18 = sadd.s32 1, %s3236_s11 }
   0x6   : > { %p36_p0 = scmp.ge.s32.totalorder %s34_s17, 2  ;;  %p259_p1 = scmp.ne.s32.totalorder %s3236_s11, %s3232_s10 }
   0x7   : > { %p260_p2 = scmp.eq.s32.totalorder %s2693_s15, 1  ;;  %p265_p3 = scmp.ne.s32.totalorder %s3232_s10, %s3228_s30 }
   0x8   : > { %s3745_s17 = smov (%p36_p0, %s34_s17), 0  ;;  %p266_p5 = scmp.eq.s32.totalorder %s2694_s16, 1 }
   0x9   : > { %p3344_p4 = por %p260_p2, %p259_p1  ;;  %s244_s20 = ssub.s32 %s3244_s13, %s3745_s17 }
   0xa   : > { %p2697_p6 = scmp.ge.s32.totalorder %s3248_s14, 1  ;;  %p247_p7 = scmp.eq.s32.totalorder %s244_s20, 0 }
   0xb   : > { %p3351_p8 = por %p266_p5, %p265_p3  ;;  %p326_p9 = scmp.lt.s32.totalorder %s3248_s14, 3 }
   0xc   : > { %s3357_s22 = scalar_select %p247_p7, %s3236_s11, %s249_s18  }
   0xd   : > { %p327_p10 = pnand %p2697_p6, %p326_p9 }
   0xe   : > { %v2702_v0 = vld [vmem:[%s3730_s3 + $0x20] sm:$0xff] (!%p327_p10)  ;;  %v2703_v1 = vld [vmem:[%s3730_s3 + $0x28] sm:$0xff] (!%p327_p10)  ;;  %v2704_v2 = vld [vmem:[%s3730_s3 + $0x30] sm:$0xff] (!%p327_p10)  ;;  %v3250_v3 = vmov (!%p327_p10), 0.0|0.0   ;;  %vm3251_vm0 = vmmov (!%p327_p10), 0   ;;  %v3252_v6 = vmov (!%p327_p10), 0.0  }
   0xf   : > { %330 = sbr.rel (%p327_p10) target bundleno = 1723 (0x6bb), region = 56  ;;  %3042 = vmatprep.subr.bf16.mxu0 (!%p327_p10), %v3250_v3  ;;  %v3043_v4 = vpack.c.bf16 (!%p327_p10), %v2703_v1, %v2702_v0  ;;  %v2705_v5 = vld [vmem:[%s3730_s3 + $0x38] sm:$0xff] (!%p327_p10)  ;;  %2873 = vmatprep.mubr.msk.f32.mxu0 (!%p327_p10), %vm3251_vm0, %v3252_v6  ;;  %p372_p11 = scmp.lt.s32.totalorder (!%p327_p10), %s3240_s12, 1  ;;  %v2713_v8 = vld [vmem:[%s3732_s5 + $0x60] sm:$0xff] (!%p327_p10)  ;;  %v2714_v9 = vld [vmem:[%s3732_s5 + $0x68] sm:$0xff] (!%p327_p10)  ;;  %vm405_vm1 = vcmask (!%p327_p10), 261120  }
  0x10   : > { %3048 = vmatprep.subr.bf16.mxu1 (!%p327_p10), %v3250_v3  ;;  %2880 = vmatprep.mubr.msk.f32.mxu1 (!%p327_p10), %vm3251_vm0, %v3252_v6  ;;  %v3046_v7 = vpack.c.bf16 (!%p327_p10), %v2705_v5, %v2704_v2  ;;  %v3055_v11 = vpack.c.bf16 (!%p327_p10), %v2714_v9, %v2713_v8  ;;  %v2709_v12 = vld [vmem:[%s3732_s5 + $0x40] sm:$0xff] (!%p327_p10)  ;;  %v2710_v13 = vld [vmem:[%s3732_s5 + $0x48] sm:$0xff] (!%p327_p10)  ;;  %v2711_v17 = vld [vmem:[%s3732_s5 + $0x50] sm:$0xff] (!%p327_p10)  ;;  %vm517_vm2 = vcmask (!%p327_p10), 130048   ;;  %vm801_vm3 = vcmask (!%p327_p10), 64512   ;;  %s369_s29 = sand.u32 (!%p327_p10), 1, %s3232_s10  }
  0x11   : > { %3044 = vmatpush3.bf16.msra.mxu0 (!%p327_p10), %v3043_v4  ;;  %v3049_v14 = vpack.c.bf16 (!%p327_p10), %v2710_v13, %v2709_v12  ;;  %v2729_v15 = vld [vmem:[%s3730_s3 + $0x40] sm:$0xff] (!%p327_p10)  ;;  %v2730_v16 = vld [vmem:[%s3730_s3 + $0x48] sm:$0xff] (!%p327_p10)  ;;  %v2712_v18 = vld [vmem:[%s3732_s5 + $0x58] sm:$0xff] (!%p327_p10)  ;;  %s2787_s18 = sshll.u32 (!%p327_p10), %s3240_s12, 7 }
  0x12   : > { %3045 = vmatprep.subr.bf16.mxu0 (!%p327_p10), %v3250_v3  ;;  %v2707_v19 = vld [vmem:[%s3731_s4 + $0x1] ss:$0 sm:$0xff] (!%p327_p10)  ;;  %v3061_v21 = vpack.c.bf16 (!%p327_p10), %v2730_v16, %v2729_v15  ;;  %v3052_v22 = vpack.c.bf16 (!%p327_p10), %v2712_v18, %v2711_v17  ;;  %v2731_v23 = vld [vmem:[%s3730_s3 + $0x50] sm:$0xff] (!%p327_p10)  ;;  %v2732_v26 = vld [vmem:[%s3730_s3 + $0x58] sm:$0xff] (!%p327_p10)  ;;  %s3679_s27 = scalar_lea.hbm (!%p327_p10), %s3736_s9, %s2787_s18 }
  0x13   : > { %3050 = vmatpush3.bf16.msra.mxu1 (!%p327_p10), %v3049_v14  ;;  %v2715_v27 = vld [vmem:[%s3732_s5 + $0x70] sm:$0xff] (!%p327_p10)  ;;  %v2716_v28 = vld [vmem:[%s3732_s5 + $0x78] sm:$0xff] (!%p327_p10)  ;;  %v3064_v29 = vpack.c.bf16 (!%p327_p10), %v2732_v26, %v2731_v23  ;;  %v2740_v32 = vld [vmem:[%s3732_s5 + $0xa0] sm:$0xff] (!%p327_p10) }
  0x14   : > { %3051 = vmatprep.subr.bf16.mxu1 (!%p327_p10), %v3250_v3  ;;  %v3058_v30 = vpack.c.bf16 (!%p327_p10), %v2716_v28, %v2715_v27  ;;  %v2741_v33 = vld [vmem:[%s3732_s5 + $0xa8] sm:$0xff] (!%p327_p10)  ;;  %v2736_v35 = vld [vmem:[%s3732_s5 + $0x80] sm:$0xff] (!%p327_p10)  ;;  %v2738_v52 = vld [vmem:[%s3732_s5 + $0x90] sm:$0xff] (!%p327_p10) }
  0x15   : > { %3047 = vmatpush3.bf16.msra.mxu0 (!%p327_p10), %v3046_v7  ;;  %v3073_v34 = vpack.c.bf16 (!%p327_p10), %v2741_v33, %v2740_v32  ;;  %v2737_v36 = vld [vmem:[%s3732_s5 + $0x88] sm:$0xff] (!%p327_p10)  ;;  %v2721_v38 = vld [vmem:[%s3733_s6 + $0x4] ss:$0 sm:$0xff] (!%p327_p10)  ;;  %v2723_v39 = vld [vmem:[%s3733_s6 + $0x6] ss:$0 sm:$0xff] (!%p327_p10) }
  0x16   : > { %s373_s16 = scalar_select %p372_p11, %s3240_s12, 1  ;;  %3054 = vmatprep.subr.bf16.mxu0 %v3250_v3  ;;  %v3067_v37 = vpack.c.bf16 %v2737_v36, %v2736_v35  ;;  %v2722_v46 = vld [vmem:[%s3733_s6 + $0x5] ss:$0 sm:$0xff]  ;;  %v1220_v51 = vld [vmem:[%s3730_s3 + $0x8] sm:$0xff]  ;;  %v2739_v53 = vld [vmem:[%s3732_s5 + $0x98] sm:$0xff] }
  0x17   : > { %v1219_v48 = vld [vmem:[%s3730_s3] sm:$0xff]  ;;  %v3070_v59 = vpack.c.bf16 %v2739_v53, %v2738_v52  ;;  %v1221_v60 = vld [vmem:[%s3730_s3 + $0x10] sm:$0xff]  ;;  %v1222_v1 = vld [vmem:[%s3730_s3 + $0x18] sm:$0xff]  ;;  %s3253_s12 = smov [#allocation4]  }
  0x18   : > { %s3386_s25 = sshll.u32 %s373_s16, 3  ;;  %v2734_v54 = vld [vmem:[%s3731_s4 + $0x2] ss:$0 sm:$0xff]  ;;  %v2724_v55 = vld [vmem:[%s3733_s6 + $0x7] ss:$0 sm:$0xff]  ;;  %v3079_v58 = vpack.c.bf16 %v1220_v51, %v1219_v48  ;;  %v2742_v2 = vld [vmem:[%s3732_s5 + $0xb0] sm:$0xff]  ;;  %v3082_v5 = vpack.c.bf16 %v1222_v1, %v1221_v60 }
  0x19   : > { %s382_s28 = scalar_lea.vmem %s3728_s1, %s3386_s25  ;;  %s386_s20 = scalar_lea.vmem %s3729_s2, %s3386_s25  ;;  %v2743_v4 = vld [vmem:[%s3732_s5 + $0xb8] sm:$0xff]  ;;  %v1308_v9 = vld [vmem:[%s3732_s5 + $0x20] sm:$0xff]  ;;  %v1305_v13 = vld [vmem:[%s3732_s5 + $0x8] sm:$0xff] }
  0x1a   : > { %v391_v10 = vld [vmem:[%s382_s28] sm:$0xff]  ;;  %v3076_v7 = vpack.c.bf16 %v2743_v4, %v2742_v2  ;;  %s378_s15 = scalar_lea.vmem %s3727_s0, %s3386_s25  ;;  %v2748_v15 = vld [vmem:[%s3733_s6 + $0x8] ss:$0 sm:$0xff]  ;;  %v2750_v16 = vld [vmem:[%s3733_s6 + $0xa] ss:$0 sm:$0xff]  ;;  %s2584_s28 = scalar_lea.sflag [#allocation5], %s369_s29 }
  0x1b   : > { %2874 = vmatmul.mubr.msk.f32.vlgmr.msra.gmra.mrb[0].mxu0 %vm405_vm1, %v391_v10  ;;  %v806_v31 = vld [vmem:[%s386_s20] sm:$0xff]  ;;  %v1309_v10 = vld [vmem:[%s3732_s5 + $0x28] sm:$0xff]  ;;  %v1306_v27 = vld [vmem:[%s3732_s5 + $0x10] sm:$0xff] }
  0x1c   : > { %3056 = vmatpush3.bf16.msra.mxu0 %v3055_v11  ;;  %2894 = vmatprep.mubr.msk.f32.mxu0 %vm3251_vm0, %v3252_v6  ;;  %v1218_v8 = vld [vmem:[%s378_s15] sm:$0xff]  ;;  %v3091_v11 = vpack.c.bf16 %v1309_v10, %v1308_v9  ;;  %v2749_v23 = vld [vmem:[%s3733_s6 + $0x9] ss:$0 sm:$0xff]  ;;  %v1307_v28 = vld [vmem:[%s3732_s5 + $0x18] sm:$0xff]  ;;  %s2698_s15 = sshll.u32 %s369_s29, 3 }
  0x1d   : > { %3060 = vmatprep.subr.bf16.mxu0 %v3250_v3  ;;  %v1304_v12 = vld [vmem:[%s3732_s5] sm:$0xff]  ;;  %v3088_v33 = vpack.c.bf16 %v1307_v28, %v1306_v27  ;;  %s371_s20 = scalar_lea.vmem [#allocation4], %s2698_s15  ;;  %s3174_s15 = sshll.u32 %s3253_s12, 4  ;;  %s3175_s15 = int_to_ptr.vmem [resolvable:$false] %s3174_s15 }
  0x1e   : > { %v3085_v14 = vpack.c.bf16 %v1305_v13, %v1304_v12  ;;  %v2760_v48 = vld [vmem:[%s3733_s6 + $0x2] ss:$0 sm:$0xff]  ;;  %s2598_s23 = sshll.u32 %s371_s20, 4  ;;  %s3176_s16 = scalar_lea.vmem %s3175_s15, 256  ;;  %s3681_s23 = int_to_ptr.vmem [resolvable:$true] %s2598_s23 }
  0x1f   : > { %s3170_s25 = scalar_lea.vmem %s3681_s23, 128  ;;  %p3177_p1 = scmp.lt.s32.totalorder %s3681_s23, %s3175_s15 }
  0x20   : > { %p3171_p12 = scmp.ne.s32.totalorder %s3681_s23, %s3170_s25  ;;  %p3178_p2 = scmp.lt.s32.totalorder %s3176_s16, %s3170_s25 }
  0x22   : > { %p3172_p13 = pnand %p3171_p12, %p3344_p4  ;;  %p3179_p3 = por %p3178_p2, %p3177_p1 }
  0x24   : > { %p3173_p0 = pneg %p3172_p13 }
  0x26   : > { %p3180_p5 = pnand %p3179_p3, %p3173_p0 }
  0xee   : > { %v475_v20 = vpop.f32.mrb[0].mxu0 }
  0xef   : > { %v476_v24 = vadd.f32 %v2707_v19, %v475_v20  ;;  %v2875_v25 = vpop.f32.mrb[1].mxu0 }
  0xf1   : > { %2881 = vmatmul.mubr.msk.f32.vlgmr.msra.gmra.mrb[0].mxu1 %vm517_vm2, %v476_v24  ;;  %2895 = vmatmul.mubr.msk.f32.vlgmr.msra.gmra.mrb[2].mxu0 %vm517_vm2, %v476_v24 }
  0xf2   : > { %3062 = vmatpush3.bf16.msra.mxu0 %v3061_v21  ;;  %3053 = vmatpush3.bf16.msra.mxu1 %v3052_v22 }
  0xf3   : > { %2887 = vmatprep.mubr.msk.f32.mxu1 %vm3251_vm0, %v3252_v6  ;;  %3063 = vmatprep.subr.bf16.mxu0 %v3250_v3 }
  0xf4   : > { %3057 = vmatprep.subr.bf16.mxu1 %v3250_v3  ;;  %2912 = vmatprep.mubr.msk.f32.mxu0 %vm3251_vm0, %v3252_v6 }
  0xf5   : > { %2888 = vmatmul.mubr.msk.f32.vlgmr.msra.gmra.mrb[2].mxu1 %vm517_vm2, %v476_v24 }
  0xf6   : > { %3065 = vmatpush3.bf16.msra.mxu0 %v3064_v29  ;;  %3059 = vmatpush3.bf16.msra.mxu1 %v3058_v30  ;;  %v2756_v29 = vld [vmem:[%s3731_s4] ss:$0 sm:$0xff]  ;;  %v2751_v30 = vld [vmem:[%s3733_s6 + $0xb] ss:$0 sm:$0xff] }
  0xf7   : > { %2901 = vmatprep.mubr.msk.f32.mxu1 %vm3251_vm0, %v3252_v6  ;;  %3072 = vmatprep.subr.bf16.mxu0 %v3250_v3 }
  0xf8   : > { %3066 = vmatprep.subr.bf16.mxu1 %v3250_v3 }
  0xf9   : > { %2913 = vmatmul.mubr.msk.f32.vlgmr.msra.gmra.mrb[4].mxu0 %vm405_vm1, %v806_v31  ;;  %2902 = vmatmul.mubr.msk.f32.vlgmr.msra.gmra.mrb[4].mxu1 %vm517_vm2, %v476_v24 }
  0xfa   : > { %2919 = vmatprep.mubr.msk.f32.mxu1 %vm3251_vm0, %v3252_v6  ;;  %2933 = vmatprep.mubr.msk.f32.mxu0 %vm3251_vm0, %v3252_v6 }
  0xfb   : > { %3074 = vmatpush3.bf16.msra.mxu0 %v3073_v34  ;;  %3068 = vmatpush3.bf16.msra.mxu1 %v3067_v37 }
  0xfc   : > { %3078 = vmatprep.subr.bf16.mxu0 %v3250_v3  ;;  %3069 = vmatprep.subr.bf16.mxu1 %v3250_v3 }
 0x1c4   : > { %v587_v40 = vpop.f32.mrb[0].mxu1  ;;  %v727_v41 = vpop.f32.mrb[2].mxu0 }
 0x1c5   : > { %v588_v42 = vadd.f32 %v2721_v38, %v587_v40  ;;  %v728_v43 = vadd.f32 %v2723_v39, %v727_v41  ;;  %v2882_v44 = vpop.f32.mrb[1].mxu1  ;;  %v2896_v45 = vpop.f32.mrb[3].mxu0  ;;  %v1310_v38 = vld [vmem:[%s3732_s5 + $0x30] sm:$0xff]  ;;  %v1311_v39 = vld [vmem:[%s3732_s5 + $0x38] sm:$0xff] }
 0x1c6   : > { %v3094_v41 = vpack.c.bf16 %v1311_v39, %v1310_v38 }
 0x1c7   : > { %802 = vst.msk [vmem:[#allocation2] sm:$0xff] %vm801_vm3, %v588_v42  ;;  %804 = vst.msk [vmem:[#allocation2 + $0x10] sm:$0xff] %vm801_vm3, %v728_v43 }
 0x1c8   : > { %v657_v47 = vpop.f32.mrb[2].mxu1 }
 0x1c9   : > { %v658_v49 = vadd.f32 %v2722_v46, %v657_v47  ;;  %v2889_v50 = vpop.f32.mrb[3].mxu1 }
 0x1cb   : > { %803 = vst.msk [vmem:[#allocation2 + $0x8] sm:$0xff] %vm801_vm3, %v658_v49  ;;  %v2759_v49 = vld [vmem:[%s3733_s6 + $0x1] ss:$0 sm:$0xff] }
 0x1cc   : > { %v889_v56 = vpop.f32.mrb[4].mxu0  ;;  %v797_v57 = vpop.f32.mrb[4].mxu1 }
 0x1cd   : > { %v890_v61 = vadd.f32 %v2734_v54, %v889_v56  ;;  %v798_v62 = vadd.f32 %v2724_v55, %v797_v57  ;;  %v2914_v63 = vpop.f32.mrb[5].mxu0  ;;  %v2903_v0 = vpop.f32.mrb[5].mxu1  ;;  %v2761_v55 = vld [vmem:[%s3733_s6 + $0x3] ss:$0 sm:$0xff] }
 0x1ce   : > { %v1624_v40 = vld [vmem:[#allocation2] sm:$0xff]  ;;  %v1626_v50 = vld [vmem:[#allocation2 + $0x10] sm:$0xff] }
 0x1cf   : > { %805 = vst.msk [vmem:[#allocation2 + $0x18] sm:$0xff] %vm801_vm3, %v798_v62  ;;  %2920 = vmatmul.mubr.msk.f32.vlgmr.msra.gmra.mrb[6].mxu1 %vm517_vm2, %v890_v61  ;;  %2934 = vmatmul.mubr.msk.f32.vlgmr.msra.gmra.mrb[6].mxu0 %vm517_vm2, %v890_v61 }
 0x1d0   : > { %3080 = vmatpush3.bf16.msra.mxu0 %v3079_v58  ;;  %3071 = vmatpush3.bf16.msra.mxu1 %v3070_v59 }
 0x1d1   : > { %2926 = vmatprep.mubr.msk.f32.mxu1 %vm3251_vm0, %v3252_v6  ;;  %3081 = vmatprep.subr.bf16.mxu0 %v3250_v3 }
 0x1d2   : > { %3075 = vmatprep.subr.bf16.mxu1 %v3250_v3  ;;  %2951 = vmatprep.mubr.msk.f32.mxu0 %vm3251_vm0, %v3252_v6  ;;  %v1625_v42 = vld [vmem:[#allocation2 + $0x8] sm:$0xff] }
 0x1d3   : > { %2927 = vmatmul.mubr.msk.f32.vlgmr.msra.gmra.mrb[8].mxu1 %vm517_vm2, %v890_v61 }
 0x1d4   : > { %3083 = vmatpush3.bf16.msra.mxu0 %v3082_v5  ;;  %3077 = vmatpush3.bf16.msra.mxu1 %v3076_v7 }
 0x1d5   : > { %2940 = vmatprep.mubr.msk.f32.mxu1 %vm3251_vm0, %v3252_v6  ;;  %3090 = vmatprep.subr.bf16.mxu0 %v3250_v3 }
 0x1d6   : > { %3084 = vmatprep.subr.bf16.mxu1 %v3250_v3  ;;  %v1627_v56 = vld [vmem:[#allocation2 + $0x18] sm:$0xff] }
 0x1d7   : > { %2952 = vmatmul.mubr.msk.f32.vlgmr.msra.gmra.mrb[8].mxu0 %vm405_vm1, %v1218_v8  ;;  %2941 = vmatmul.mubr.msk.f32.vlgmr.msra.gmra.mrb[10].mxu1 %vm517_vm2, %v890_v61 }
 0x1d8   : > { %2958 = vmatprep.mubr.msk.f32.mxu1 %vm3251_vm0, %v3252_v6  ;;  %2972 = vmatprep.mubr.msk.f32.mxu0 %vm3251_vm0, %v3252_v6 }
 0x1d9   : > { %3092 = vmatpush3.bf16.msra.mxu0 %v3091_v11  ;;  %3086 = vmatpush3.bf16.msra.mxu1 %v3085_v14 }
 0x1da   : > { %2982 = vmatprep.subr.mxu0 %v3252_v6  ;;  %3087 = vmatprep.subr.bf16.mxu1 %v3250_v3 }
 0x2a2   : > { %v1000_v17 = vpop.f32.mrb[6].mxu1  ;;  %v1140_v18 = vpop.f32.mrb[6].mxu0 }
 0x2a3   : > { %v1001_v19 = vadd.f32 %v2748_v15, %v1000_v17  ;;  %v1141_v20 = vadd.f32 %v2750_v16, %v1140_v18  ;;  %v2921_v21 = vpop.f32.mrb[7].mxu1  ;;  %v2935_v22 = vpop.f32.mrb[7].mxu0 }
 0x2a5   : > { %1214 = vst.msk [vmem:[#allocation3] sm:$0xff] %vm801_vm3, %v1001_v19  ;;  %1216 = vst.msk [vmem:[#allocation3 + $0x10] sm:$0xff] %vm801_vm3, %v1141_v20 }
 0x2a6   : > { %v1070_v24 = vpop.f32.mrb[8].mxu1 }
 0x2a7   : > { %v1071_v25 = vadd.f32 %v2749_v23, %v1070_v24  ;;  %v2928_v26 = vpop.f32.mrb[9].mxu1 }
 0x2a9   : > { %1215 = vst.msk [vmem:[#allocation3 + $0x8] sm:$0xff] %vm801_vm3, %v1071_v25 }
 0x2aa   : > { %v1300_v31 = vpop.f32.mrb[8].mxu0  ;;  %v1210_v32 = vpop.f32.mrb[10].mxu1 }
 0x2ab   : > { %v1301_v34 = vadd.f32 %v2756_v29, %v1300_v31  ;;  %v1211_v35 = vadd.f32 %v2751_v30, %v1210_v32  ;;  %v2953_v36 = vpop.f32.mrb[9].mxu0  ;;  %v2942_v37 = vpop.f32.mrb[11].mxu1 }
 0x2ac   : > { %v1628_v57 = vld [vmem:[#allocation3] sm:$0xff]  ;;  %v1630_v25 = vld [vmem:[#allocation3 + $0x10] sm:$0xff] }
 0x2ad   : > { %1217 = vst.msk [vmem:[#allocation3 + $0x18] sm:$0xff] %vm801_vm3, %v1211_v35  ;;  %2959 = vmatmul.mubr.msk.f32.vlgmr.msra.gmra.mrb[12].mxu1 %vm517_vm2, %v1301_v34  ;;  %2973 = vmatmul.mubr.msk.f32.vlgmr.msra.gmra.mrb[10].mxu0 %vm517_vm2, %v1301_v34  ;;  %v2778_v35 = vld [vmem:[%s3734_s7 + $0x8] sm:$0xff] }
 0x2ae   : > { %3089 = vmatpush3.bf16.msra.mxu1 %v3088_v33  ;;  %2983 = vmatpush3.xpose.msk.msra.mxu0 %vm801_vm3, %v1624_v40 }
 0x2af   : > { %2965 = vmatprep.mubr.msk.f32.mxu1 %vm3251_vm0, %v3252_v6  ;;  %3093 = vmatprep.subr.bf16.mxu1 %v3250_v3  ;;  %v2758_v3 = vld [vmem:[%s3733_s6] ss:$0 sm:$0xff] }
 0x2b0   : > { %2984 = vmatprep.mubr.msk.f32.mxu0 %vm3251_vm0, %v3252_v6  ;;  %2992 = vmatprep.subr.mxu0 %v3252_v6  ;;  %v1629_v61 = vld [vmem:[#allocation3 + $0x8] sm:$0xff] }
 0x2b1   : > { %2966 = vmatmul.mubr.msk.f32.vlgmr.msra.gmra.mrb[14].mxu1 %vm517_vm2, %v1301_v34 }
 0x2b2   : > { %3095 = vmatpush3.bf16.msra.mxu1 %v3094_v41  ;;  %2979 = vmatprep.mubr.msk.f32.mxu1 %vm3251_vm0, %v3252_v6 }
 0x2b3   : > { %2987 = vmatprep.subr.mxu1 %v3252_v6 }
 0x2b4   : > { %v1631_v29 = vld [vmem:[#allocation3 + $0x18] sm:$0xff] }
 0x2b5   : > { %2980 = vmatmul.mubr.msk.f32.vlgmr.msra.gmra.mrb[16].mxu1 %vm517_vm2, %v1301_v34  ;;  %v2273_v34 = vld [vmem:[%s3734_s7] sm:$0xff] }
 0x2b6   : > { %2989 = vmatprep.mubr.msk.f32.mxu1 %vm3251_vm0, %v3252_v6 }
 0x2bb   : > { %2988 = vmatpush3.xpose.msk.msra.mxu1 %vm801_vm3, %v1625_v42 }
 0x2bc   : > { %2997 = vmatprep.subr.mxu1 %v3252_v6 }
 0x380   : > { %v1410_v43 = vpop.f32.mrb[12].mxu1  ;;  %v1550_v44 = vpop.f32.mrb[10].mxu0 }
 0x381   : > { %v1411_v45 = vadd.f32 %v2758_v3, %v1410_v43  ;;  %v2960_v46 = vpop.f32.mrb[13].mxu1  ;;  %v2974_v47 = vpop.f32.mrb[11].mxu0  ;;  %v1551_v52 = vadd.f32 %v2760_v48, %v1550_v44  ;;  %v2783_v43 = vld [vmem:[%s3734_s7 + $0x18] sm:$0xff] }
 0x383   : > { %2985 = vmatmul.mubr.msk.f32.vlgmr.msra.gmra.mrb[12].mxu0 %vm801_vm3, %v1411_v45 }
 0x384   : > { %2993 = vmatpush3.xpose.msk.msra.mxu0 %vm801_vm3, %v1626_v50  ;;  %v1480_v51 = vpop.f32.mrb[14].mxu1  ;;  %2994 = vmatprep.mubr.msk.f32.mxu0 %vm3251_vm0, %v3252_v6 }
 0x385   : > { %v1481_v53 = vadd.f32 %v2759_v49, %v1480_v51  ;;  %v2967_v54 = vpop.f32.mrb[15].mxu1  ;;  %3002 = vmatprep.subr.mxu0 %v3252_v6  ;;  %v2781_v49 = vld [vmem:[%s3734_s7 + $0x10] sm:$0xff] }
 0x387   : > { %2990 = vmatmul.mubr.msk.f32.vlgmr.msra.gmra.mrb[18].mxu1 %vm801_vm3, %v1481_v53  ;;  %2995 = vmatmul.mubr.msk.f32.vlgmr.msra.gmra.mrb[14].mxu0 %vm801_vm3, %v1551_v52 }
 0x388   : > { %2998 = vmatpush3.xpose.msk.msra.mxu1 %vm801_vm3, %v1627_v56  ;;  %3003 = vmatpush3.msra.mxu0 %v1628_v57  ;;  %v1620_v58 = vpop.f32.mrb[16].mxu1 }
 0x389   : > { %v1621_v59 = vadd.f32 %v2761_v55, %v1620_v58  ;;  %v2981_v60 = vpop.f32.mrb[17].mxu1  ;;  %2999 = vmatprep.mubr.msk.f32.mxu1 %vm3251_vm0, %v3252_v6  ;;  %3007 = vmatprep.subr.mxu1 %v3252_v6 }
 0x38a   : > { %3004 = vmatprep.mubr.msk.f32.mxu0 %vm3251_vm0, %v3252_v6  ;;  %3012 = vmatprep.subr.mxu0 %v3252_v6 }
 0x38b   : > { %3000 = vmatmul.mubr.msk.f32.vlgmr.msra.gmra.mrb[20].mxu1 %vm801_vm3, %v1621_v59 }
 0x38c   : > { %3008 = vmatpush3.msra.mxu1 %v1629_v61  ;;  %3009 = vmatprep.mubr.msk.f32.mxu1 %vm3251_vm0, %v3252_v6 }
 0x38d   : > { %3017 = vmatprep.subr.mxu1 %v3252_v6 }
 0x456   : > { %v1705_v62 = vpop.f32.mrb[12].mxu0 }
 0x457   : > { %v2986_v63 = vpop.f32.mrb[13].mxu0  ;;  %v1937_v0 = vsel %vm801_vm3, %v1705_v62, -inf }
 0x458   : > { %1938 = vmax.xlane.f32.xlu0 %v1937_v0 }
 0x45a   : > { %v1781_v1 = vpop.f32.mrb[18].mxu1  ;;  %v1857_v2 = vpop.f32.mrb[14].mxu0 }
 0x45b   : > { %v2991_v4 = vpop.f32.mrb[19].mxu1  ;;  %v2996_v5 = vpop.f32.mrb[15].mxu0  ;;  %v1940_v7 = vsel %vm801_vm3, %v1781_v1, -inf  ;;  %v1943_v8 = vsel %vm801_vm3, %v1857_v2, -inf }
 0x45c   : > { %1941 = vmax.xlane.f32.xlu0 %v1940_v7  ;;  %1944 = vmax.xlane.f32.xlu1 %v1943_v8 }
 0x45e   : > { %v1933_v9 = vpop.f32.mrb[20].mxu1 }
 0x45f   : > { %v3001_v10 = vpop.f32.mrb[21].mxu1  ;;  %v1946_v11 = vsel %vm801_vm3, %v1933_v9, -inf }
 0x460   : > { %1947 = vmax.xlane.f32.xlu1 %v1946_v11 }
 0x4e5   : > { %v1939_v12 = vpop.xlane.xlu0 %1938 }
 0x4e6   : > { %v1949_v13 = vsub.f32 %v1705_v62, %v1939_v12 }
 0x4e8   : > { %v1953_v14 = vmul.f32 1.442695, %v1949_v13 }
 0x4e9   : > { %v1942_v15 = vpop.xlane.xlu0 %1941  ;;  %v1945_v16 = vpop.xlane.xlu1 %1944 }
 0x4ea   : > { %3154 = vpow2.f32 %v1953_v14  ;;  %v1950_v17 = vsub.f32 %v1781_v1, %v1942_v15  ;;  %v1951_v18 = vsub.f32 %v1857_v2, %v1945_v16  ;;  %v2785_v2 = vld [vmem:[%s3735_s8] ss:$0 sm:$0xff] }
 0x4ec   : > { %v1955_v19 = vmul.f32 1.442695, %v1950_v17  ;;  %v1957_v20 = vmul.f32 1.442695, %v1951_v18 }
 0x4ed   : > { %v1948_v21 = vpop.xlane.xlu1 %1947 }
 0x4ee   : > { %3156 = vpow2.f32 %v1955_v19  ;;  %v1952_v22 = vsub.f32 %v1933_v9, %v1948_v21 }
 0x4ef   : > { %3158 = vpow2.f32 %v1957_v20 }
 0x4f0   : > { %v1959_v23 = vmul.f32 1.442695, %v1952_v22 }
 0x4f2   : > { %3160 = vpow2.f32 %v1959_v23 }
 0x4f4   : > { %v3155_v24 = vpop.eup %3154 }
 0x4f5   : > { %3005 = vmatmul.mubr.msk.f32.vlgmr.msra.gmra.mrb[16].mxu0 %vm801_vm3, %v3155_v24  ;;  %v1961_v26 = vsel %vm801_vm3, %v3155_v24, 0.0 }
 0x4f6   : > { %3013 = vmatpush3.msra.mxu0 %v1630_v25  ;;  %1962 = vadd.xlane.f32.xlu1 %v1961_v26 }
 0x4f7   : > { %3014 = vmatprep.mubr.msk.f32.mxu0 %vm3251_vm0, %v3252_v6  ;;  %3022 = vmatprep.subr.mxu0 %v3252_v6 }
 0x4f8   : > { %v3157_v27 = vpop.eup %3156 }
 0x4f9   : > { %v3159_v28 = vpop.eup %3158  ;;  %3010 = vmatmul.mubr.msk.f32.vlgmr.msra.gmra.mrb[22].mxu1 %vm801_vm3, %v3157_v27  ;;  %v1964_v30 = vsel %vm801_vm3, %v3157_v27, 0.0 }
 0x4fa   : > { %3015 = vmatmul.mubr.msk.f32.vlgmr.msra.gmra.mrb[18].mxu0 %vm801_vm3, %v3159_v28  ;;  %3018 = vmatpush3.msra.mxu1 %v1631_v29  ;;  %v1967_v33 = vsel %vm801_vm3, %v3159_v28, 0.0 }
 0x4fb   : > { %1965 = vadd.xlane.f32.xlu0 %v1964_v30  ;;  %3019 = vmatprep.mubr.msk.f32.mxu1 %vm3251_vm0, %v3252_v6 }
 0x4fc   : > { %v3161_v31 = vpop.eup %3160  ;;  %3027 = vmatprep.subr.mxu1 %v3252_v6  ;;  %3024 = vmatprep.mubr.msk.f32.mxu0 %vm3251_vm0, %v3252_v6 }
 0x4fd   : > { %3020 = vmatmul.mubr.msk.f32.vlgmr.msra.gmra.mrb[24].mxu1 %vm801_vm3, %v3161_v31  ;;  %v1970_v32 = vsel %vm801_vm3, %v3161_v31, 0.0  ;;  %3023 = vmatpush3.msra.mxu0 %v2778_v35 }
 0x4fe   : > { %1971 = vadd.xlane.f32.xlu1 %v1970_v32  ;;  %3029 = vmatprep.mubr.msk.f32.mxu1 %vm3251_vm0, %v3252_v6 }
 0x4ff   : > { %1968 = vadd.xlane.f32.xlu0 %v1967_v33  ;;  %3028 = vmatpush3.msra.mxu1 %v2273_v34 }
 0x500   : > { %3032 = vmatprep.subr.mxu0 %v3252_v6  ;;  %3037 = vmatprep.subr.mxu1 %v3252_v6 }
 0x583   : > { %v1963_v36 = vpop.xlane.xlu1 %1962 }
 0x584   : > { %3162 = vrcp.f32 %v1963_v36 }
 0x588   : > { %v1966_v37 = vpop.xlane.xlu0 %1965 }
 0x589   : > { %3164 = vrcp.f32 %v1966_v37 }
 0x58b   : > { %v1972_v38 = vpop.xlane.xlu1 %1971 }
 0x58c   : > { %v1969_v39 = vpop.xlane.xlu0 %1968  ;;  %3166 = vrcp.f32 %v1972_v38 }
 0x58d   : > { %3168 = vrcp.f32 %v1969_v39 }
 0x58e   : > { %v3163_v40 = vpop.eup %3162 }
 0x593   : > { %v3165_v44 = vpop.eup %3164 }
 0x596   : > { %v3167_v51 = vpop.eup %3166 }
 0x597   : > { %v3169_v52 = vpop.eup %3168 }
 0x5c8   : > { %v2042_v41 = vpop.f32.mrb[16].mxu0 }
 0x5c9   : > { %v2269_v42 = vmul.f32 %v3163_v40, %v2042_v41  ;;  %v3006_v3 = vpop.f32.mrb[17].mxu0 }
 0x5cb   : > { %3030 = vmatmul.mubr.msk.f32.vlgmr.msra.gmra.mrb[26].mxu1 %vm801_vm3, %v2269_v42 }
 0x5cc   : > { %v2115_v45 = vpop.f32.mrb[22].mxu1  ;;  %3038 = vmatpush3.msra.mxu1 %v2783_v43  ;;  %3039 = vmatprep.mubr.msk.f32.mxu1 %vm3251_vm0, %v3252_v6 }
 0x5cd   : > { %v2270_v46 = vmul.f32 %v3165_v44, %v2115_v45  ;;  %v2188_v47 = vpop.f32.mrb[18].mxu0  ;;  %v3011_v48 = vpop.f32.mrb[23].mxu1 }
 0x5ce   : > { %v3016_v50 = vpop.f32.mrb[19].mxu0  ;;  %v2271_v54 = vmul.f32 %v3169_v52, %v2188_v47 }
 0x5cf   : > { %3025 = vmatmul.mubr.msk.f32.vlgmr.msra.gmra.mrb[20].mxu0 %vm801_vm3, %v2270_v46 }
 0x5d0   : > { %3033 = vmatpush3.msra.mxu0 %v2781_v49  ;;  %v2261_v53 = vpop.f32.mrb[24].mxu1  ;;  %3034 = vmatprep.mubr.msk.f32.mxu0 %vm3251_vm0, %v3252_v6 }
 0x5d1   : > { %v2272_v55 = vmul.f32 %v3167_v51, %v2261_v53  ;;  %v3021_v56 = vpop.f32.mrb[25].mxu1 }
 0x5d3   : > { %3035 = vmatmul.mubr.msk.f32.vlgmr.msra.gmra.mrb[22].mxu0 %vm801_vm3, %v2271_v54  ;;  %3040 = vmatmul.mubr.msk.f32.vlgmr.msra.gmra.mrb[28].mxu1 %vm801_vm3, %v2272_v55 }
 0x69e   : > { %v2418_v57 = vpop.f32.mrb[26].mxu1 }
 0x69f   : > { %v3031_v58 = vpop.f32.mrb[27].mxu1 }
 0x6a2   : > { %v2345_v59 = vpop.f32.mrb[20].mxu0 }
 0x6a3   : > { %v2419_v60 = vadd.f32 %v2418_v57, %v2345_v59  ;;  %v3026_v61 = vpop.f32.mrb[21].mxu0 }
 0x6a6   : > { %v2493_v62 = vpop.f32.mrb[22].mxu0  ;;  %v2569_v63 = vpop.f32.mrb[28].mxu1 }
 0x6a7   : > { %v2497_v0 = vadd.f32 %v2493_v62, %v2419_v60  ;;  %v3036_v6 = vpop.f32.mrb[23].mxu0  ;;  %v3041_v1 = vpop.f32.mrb[29].mxu1 }
 0x6a9   : > { %v2573_v4 = vadd.f32 %v2569_v63, %v2497_v0 }
 0x6ab   : > { %v2581_v5 = vadd.f32 %v2785_v2, %v2573_v4 }
 0x6ad   : > { %2582 = vst.msk [vmem:[%s371_s20] sm:$0xff] %vm405_vm1, %v2581_v5 }
 0x6ae   : > { %3183 = shalt.err (!%p3180_p5)
}
 0x6af   : > { %s3184_s29 = scalar_lea.hbm %s3679_s27, 128  ;;  %s3188_s24 = scalar_lea.hbm %s3736_s9, 256 }
 0x6b0   : > { %p3185_p6 = scmp.ne.s32.totalorder %s3679_s27, %s3184_s29  ;;  %p3189_p10 = scmp.lt.u32.totalorder %s3679_s27, %s3736_s9 }
 0x6b1   : > { %p3190_p11 = scmp.lt.u32.totalorder %s3188_s24, %s3184_s29  ;;  %p3192_p13 = scmp.lt.u32.totalorder %s3184_s29, %s3679_s27 }
 0x6b2   : > { %p3186_p7 = pnand %p3185_p6, %p3344_p4 }
 0x6b3   : > { %p3191_p12 = por %p3190_p11, %p3189_p10 }
 0x6b4   : > { %p3187_p9 = pneg %p3186_p7 }
 0x6b5   : > { %p3193_p0 = por %p3192_p13, %p3191_p12 }
 0x6b7   : > { %p3194_p1 = pnand %p3193_p0, %p3187_p9 }
 0x6b9   : > { %3197 = shalt.err (!%p3194_p1)
}
 0x6ba   : > { %3096 = dma.vmem_to_hbm [thread:$0]  (%p3344_p4), %s3681_s23, 128, %s3679_s27, %s2584_s28  }
 0x6bb PF: > { %p3102_p2 = scmp.ge.s32.totalorder %s3248_s14, 2  ;;  %s2610_s25 = sand.u32 1, %s3228_s30  }
 0x6bc   : > { %s2611_s15 = scalar_lea.sflag [#allocation5], %s2610_s25 }
 0x6bd   : > { %p3099_p3 = pnand %p3102_p2, %p3351_p8 }
 0x6bf   : > { %3223 = dma.done.wait (!%p3099_p3), %s2611_s15, 128  }
 0x6c0   : > { %3225 = vsyncadd (!%p3099_p3), %s2611_s15, 4294967168  ;;  %s22_s14 = sadd.s32 1, %s3248_s14   ;;  %s3739_s30 = smov %s3232_s10 }
 0x6c1   : > { %p19_p5 = scmp.ge.s32.totalorder %s22_s14, 4   ;;  %s3740_s10 = smov %s3236_s11 }
 0x6c2   : > { %s3741_s11 = smov %s3357_s22  ;;  %s3742_s12 = smov %s3244_s13 }
 0x6c3   : > { %s3743_s13 = smov %s3745_s17  ;;  %21 = sbr.rel (!%p19_p5) target bundleno = 4 (0x4), region = 112 }
 0x6ca   :  { %2616 = vsyncpa [#allocation5], 1 }
 0x6cb   :  { %2618 = vsyncpa [#allocation5 + $0x1], 1 }

</bundles_post_ra>
